<compile_context>
chip_gen: v6e
topology: v6e:2x2x1
jax: 0.10.0
libtpu: 0.0.40
codegen_flags: <defaults>
</compile_context>

<pallas_src>
import functools

import jax
import jax.numpy as jnp
from jax import lax
from jax.experimental import pallas as pl
from jax.experimental.pallas import tpu as pltpu


# ----------------------------------------------------------------------------
# Regular KxK conv (stride 1, "same" zero padding) as banded-weight matmuls.
# One grid step = one image.  For each kernel row kh we slice H consecutive
# padded image rows (laid out as (Hp, Wp*Cin)) and multiply by a banded weight
# matrix (Wp*Cin, W*Cout) that fuses all KW*Cin taps of that row, so the MXU
# contraction is >=128 wide and the store is lane-dense (W*Cout lanes).
# ----------------------------------------------------------------------------
def _conv_band_kernel(x_ref, w_ref, b_ref, o_ref, *, H, KH, act):
    # x_ref: (1, Hp, Wp*Cin)      bf16 zero-padded image, rows flattened (w, c)
    # w_ref: (KH, Wp*Cin, W*Cout) bf16 banded weights (per kernel row)
    # b_ref: (1, W*Cout)          f32 bias tiled over output columns
    # o_ref: (1, H, W*Cout)       f32 output, lane-dense
    xp = x_ref[0]
    acc = jnp.zeros(o_ref.shape[1:], jnp.float32) + b_ref[...]
    for kh in range(KH):
        acc = acc + jnp.dot(xp[kh:kh + H, :], w_ref[kh],
                            preferred_element_type=jnp.float32)
    if act == "offset":
        acc = 100.0 * jax.nn.sigmoid(acc) - 50.0
    elif act == "modulator":
        acc = 2.0 * jax.nn.sigmoid(acc)
    o_ref[0] = acc.astype(o_ref.dtype)


@functools.partial(jax.jit, static_argnames=("padding", "act"))
def conv2d_pallas(x_nchw, w_oihw, bias, *, padding, act=None):
    B, Cin, H, W = x_nchw.shape
    Cout, _, KH, KW = w_oihw.shape
    assert 2 * padding == KH - 1 and 2 * padding == KW - 1, "same-padding conv only"
    Hp, Wp = H + 2 * padding, W + 2 * padding

    # zero-padded channels-last image, rows flattened to (Wp*Cin) lanes, bf16 for MXU
    x_nhwc = jnp.transpose(x_nchw, (0, 2, 3, 1)).astype(jnp.float32)
    x_pad = jnp.pad(x_nhwc, ((0, 0), (padding, padding), (padding, padding), (0, 0)))
    x_rows = x_pad.reshape(B, Hp, Wp * Cin).astype(jnp.bfloat16)

    # banded weights: wband[kh, wp*Cin + c, wo*Cout + o] = w[o, c, kh, wp - wo]
    w_t = jnp.transpose(w_oihw, (2, 3, 1, 0)).astype(jnp.float32)  # (KH, KW, Cin, Cout)
    wband = jnp.zeros((KH, Wp * Cin, W * Cout), jnp.float32)
    for kw in range(KW):
        for wo in range(W):
            wband = wband.at[:, (wo + kw) * Cin:(wo + kw + 1) * Cin,
                             wo * Cout:(wo + 1) * Cout].set(w_t[:, kw])
    wband = wband.astype(jnp.bfloat16)

    b_t = jnp.tile(bias.astype(jnp.float32), W).reshape(1, W * Cout)

    kernel = functools.partial(_conv_band_kernel, H=H, KH=KH, act=act)
    out = pl.pallas_call(
        kernel,
        out_shape=jax.ShapeDtypeStruct((B, H, W * Cout), jnp.float32),
        grid_spec=pltpu.PrefetchScalarGridSpec(
            num_scalar_prefetch=0,
            grid=(B,),
            in_specs=[
                pl.BlockSpec((1, Hp, Wp * Cin), lambda b: (b, 0, 0)),
                pl.BlockSpec((KH, Wp * Cin, W * Cout), lambda b: (0, 0, 0)),
                pl.BlockSpec((1, W * Cout), lambda b: (0, 0)),
            ],
            out_specs=pl.BlockSpec((1, H, W * Cout), lambda b: (b, 0, 0)),
        ),
        compiler_params=pltpu.CompilerParams(
            dimension_semantics=("parallel",),
            vmem_limit_bytes=32 * 1024 * 1024),
    )(x_rows, wband, b_t)
    return jnp.transpose(out.reshape(B, H, W, Cout), (0, 3, 1, 2))


# ----------------------------------------------------------------------------
# Modulated deformable conv (torchvision.ops.deform_conv2d semantics).
# Grid = (batch, output-pixel tile).  Per image we pre-contract the group-zeroed,
# tap-major weights once: xw = x @ Wsep -> (HW, KK*G*Cout).  Per (tap, group) a
# single (TQ, HW) sampling matrix carries the 4 bilinear corner weights * mask
# (zero outside the image, matching torchvision), and one bf16 MXU matmul
# samp @ xw_slice accumulates directly into the (TQ, Cout) output tile.
# ----------------------------------------------------------------------------
def _deform_conv_kernel(x_ref, off_ref, msk_ref, w_ref, o_ref,
                        *, H, W, KH, KW, G, pad, TQ):
    # x_ref:   (1, HW, C)            bf16 full image, channels-last
    # off_ref: (1, TQ, 2*G*KH*KW)    f32 offsets, channel order (g, tap, [dy, dx])
    # msk_ref: (1, TQ, G*KH*KW)      f32 modulator mask, channel order (g, tap)
    # w_ref:   (C, KK*G*Cout)        bf16 group-separated tap-major weights
    # o_ref:   (1, TQ, Cout)         f32
    HW = H * W
    KK = KH * KW
    x = x_ref[0]
    off = off_ref[0]
    msk = msk_ref[0]
    cout = o_ref.shape[-1]

    # per-image group-separated weighted activations: xw[j, (k*G+g)*Cout + o]
    xw = jnp.dot(x, w_ref[...], preferred_element_type=jnp.float32)
    xw = xw.astype(jnp.bfloat16)                                  # (HW, KK*G*Cout)

    q0 = pl.program_id(1) * TQ
    p = q0 + lax.broadcasted_iota(jnp.int32, (TQ, 1), 0)          # global pixel idx
    ho = (p // W).astype(jnp.float32)
    wo = (p % W).astype(jnp.float32)
    col_j = lax.broadcasted_iota(jnp.int32, (TQ, HW), 1)          # source-pixel index

    acc = jnp.zeros((TQ, cout), jnp.float32)
    for k in range(KK):
        kh, kw = divmod(k, KW)
        for g in range(G):
            base = g * 2 * KK + 2 * k
            dy = off[:, base:base + 1]
            dx = off[:, base + 1:base + 2]
            m = msk[:, g * KK + k:g * KK + k + 1]
            py = ho + float(kh - pad) + dy
            px = wo + float(kw - pad) + dx
            y0 = jnp.floor(py)
            x0 = jnp.floor(px)
            ly = py - y0
            lx = px - x0
            samp = jnp.zeros((TQ, HW), jnp.float32)
            for a in (0, 1):
                yc = y0 + float(a)
                wy = ly if a == 1 else 1.0 - ly
                y_ok = (yc >= 0.0) & (yc <= float(H - 1))
                yi = jnp.clip(yc, 0.0, float(H - 1))
                for bb in (0, 1):
                    xc = x0 + float(bb)
                    wx = lx if bb == 1 else 1.0 - lx
                    ok = y_ok & (xc >= 0.0) & (xc <= float(W - 1))
                    xi = jnp.clip(xc, 0.0, float(W - 1))
                    idx = (yi * float(W) + xi).astype(jnp.int32)     # (TQ, 1)
                    wgt = wy * wx * m * ok.astype(jnp.float32)       # (TQ, 1), mask folded
                    samp = samp + wgt * (col_j == idx).astype(jnp.float32)
            xw_g = xw[:, (k * G + g) * cout:(k * G + g + 1) * cout]  # (HW, Cout)
            acc = acc + jnp.dot(samp.astype(jnp.bfloat16), xw_g,
                                preferred_element_type=jnp.float32)
    o_ref[0] = acc.astype(o_ref.dtype)


@functools.partial(jax.jit, static_argnames=("offset_groups", "padding"))
def deform_conv2d_pallas(x_nchw, offset_nchw, mask_nchw, w_oihw, *,
                         offset_groups, padding):
    B, C, H, W = x_nchw.shape
    Cout, _, KH, KW = w_oihw.shape
    KK = KH * KW
    HW = H * W
    G = offset_groups
    Cg = C // G
    TQ = 128 if HW % 128 == 0 else HW
    n_q = HW // TQ

    x_flat = jnp.transpose(x_nchw, (0, 2, 3, 1)).reshape(B, HW, C).astype(jnp.bfloat16)
    off_flat = jnp.transpose(offset_nchw, (0, 2, 3, 1)).reshape(B, HW, 2 * G * KK).astype(jnp.float32)
    msk_flat = jnp.transpose(mask_nchw, (0, 2, 3, 1)).reshape(B, HW, G * KK).astype(jnp.float32)

    # group-separated tap-major weights: wsep[c, (k*G+g)*Cout + o] = w[o, c, k] if c in group g
    wt = jnp.transpose(w_oihw, (2, 3, 1, 0)).reshape(KK, C, Cout).astype(jnp.float32)
    wsep4 = jnp.zeros((KK, G, C, Cout), jnp.float32)
    for g in range(G):
        wsep4 = wsep4.at[:, g, g * Cg:(g + 1) * Cg, :].set(wt[:, g * Cg:(g + 1) * Cg, :])
    wsep = jnp.transpose(wsep4, (2, 0, 1, 3)).reshape(C, KK * G * Cout).astype(jnp.bfloat16)

    kernel = functools.partial(_deform_conv_kernel, H=H, W=W, KH=KH, KW=KW,
                               G=G, pad=padding, TQ=TQ)
    out = pl.pallas_call(
        kernel,
        out_shape=jax.ShapeDtypeStruct((B, HW, Cout), jnp.float32),
        grid_spec=pltpu.PrefetchScalarGridSpec(
            num_scalar_prefetch=0,
            grid=(B, n_q),
            in_specs=[
                pl.BlockSpec((1, HW, C), lambda b, q: (b, 0, 0)),
                pl.BlockSpec((1, TQ, 2 * G * KK), lambda b, q: (b, q, 0)),
                pl.BlockSpec((1, TQ, G * KK), lambda b, q: (b, q, 0)),
                pl.BlockSpec((C, KK * G * Cout), lambda b, q: (0, 0)),
            ],
            out_specs=pl.BlockSpec((1, TQ, Cout), lambda b, q: (b, q, 0)),
        ),
        compiler_params=pltpu.CompilerParams(
            dimension_semantics=("parallel", "parallel"),
            vmem_limit_bytes=32 * 1024 * 1024),
    )(x_flat, off_flat, msk_flat, wsep)
    return jnp.transpose(out.reshape(B, H, W, Cout), (0, 3, 1, 2))


# ----------------------------------------------------------------------------
# DeformableConv2d module (forward-pass equivalent of the PyTorch reference).
# ----------------------------------------------------------------------------
class DeformableConv2d:
    def __init__(self, in_channels, out_channels, offset_groups=4, kernel_size=3,
                 stride=1, padding=1, bias=False, offset=None, *, key):
        self.kernel_size = kernel_size if isinstance(kernel_size, tuple) else (kernel_size, kernel_size)
        self.stride = stride if isinstance(stride, tuple) else (stride, stride)
        assert self.stride == (1, 1)  # TODO(synk): generalize kernels to stride > 1
        self.padding = padding
        self.offset_groups = offset_groups
        self.offset = offset
        KH, KW = self.kernel_size
        KK = KH * KW
        Cg = in_channels // offset_groups
        ks = jax.random.split(key, 6)
        # The PyTorch module constant-inits offset_conv / modulator_conv to zero;
        # we use small deterministic random values so the deformable sampling
        # path is actually exercised (shapes match the module's __init__).
        self.offset_w = 0.05 * jax.random.normal(ks[0], (2 * KK, 2 * Cg, KH, KW), jnp.float32)
        self.offset_b = 0.05 * jax.random.normal(ks[1], (2 * KK,), jnp.float32)
        self.mod_w = 0.05 * jax.random.normal(ks[2], (offset_groups * KK, in_channels, KH, KW), jnp.float32)
        self.mod_b = 0.05 * jax.random.normal(ks[3], (offset_groups * KK,), jnp.float32)
        fan = float(in_channels * KK)
        self.reg_w = jax.random.normal(ks[4], (out_channels, in_channels, KH, KW), jnp.float32) / jnp.sqrt(fan)
        self.use_bias = bias
        self.reg_b = (jax.random.normal(ks[5], (out_channels,), jnp.float32) / jnp.sqrt(fan)
                      if bias else None)
        self.offset_loss = 0.0

    def __call__(self, warp_ref, source):
        B, C, H, W = warp_ref.shape
        G = self.offset_groups
        Cg = C // G
        KH, KW = self.kernel_size
        KK = KH * KW

        if self.offset is not None:
            offset_map = jnp.tile(self.offset, (1, KK, 1, 1))
            offset_map = 100.0 * jax.nn.sigmoid(offset_map) - 50.0
        else:
            # per offset-group: concat(warp_g, source_g) -> shared offset_conv
            wg = warp_ref.reshape(B, G, Cg, H, W)
            sg = source.reshape(B, G, Cg, H, W)
            off_in = jnp.concatenate([wg, sg], axis=2).reshape(B * G, 2 * Cg, H, W)
            offset_map = conv2d_pallas(off_in, self.offset_w, self.offset_b,
                                       padding=self.padding, act="offset")
            offset_map = offset_map.reshape(B, G * 2 * KK, H, W)

        offset_y = offset_map[:, 0::2]
        offset_x = offset_map[:, 1::2]
        # NOTE: the x/y swap below reproduces the reference module verbatim.
        offset_y_mean = jnp.mean(offset_x, axis=1, keepdims=True)
        offset_x_mean = jnp.mean(offset_y, axis=1, keepdims=True)
        offset = jnp.concatenate([offset_x_mean, offset_y_mean], axis=1)

        modulator = conv2d_pallas(warp_ref, self.mod_w, self.mod_b,
                                  padding=self.padding, act="modulator")

        # side effect only (not returned by forward); plain-JAX glue
        self.offset_loss = (jnp.mean(jnp.abs(offset_x - lax.stop_gradient(offset_x_mean)))
                            + jnp.mean(jnp.abs(offset_y - lax.stop_gradient(offset_y_mean))))

        x = deform_conv2d_pallas(warp_ref, offset_map, modulator, self.reg_w,
                                 offset_groups=G, padding=self.padding)
        if self.use_bias:
            x = x + self.reg_b.reshape(1, -1, 1, 1)
        return x, offset


if __name__ == "__main__":
    key = jax.random.PRNGKey(0)
    k_warp, k_src, k_params = jax.random.split(key, 3)
    B, C, H, W = 2, 8, 16, 16
    Cout = 8
    warp_ref = jax.random.normal(k_warp, (B, C, H, W), jnp.float32)
    source = jax.random.normal(k_src, (B, C, H, W), jnp.float32)

    dcn = DeformableConv2d(C, Cout, offset_groups=4, kernel_size=3,
                           stride=1, padding=1, bias=False, key=k_params)
    x, offset = dcn(warp_ref, source)
    jax.block_until_ready((x, offset))

    assert x.shape == (B, Cout, H, W)
    assert offset.shape == (B, 2, H, W)
    assert bool(jnp.all(jnp.isfinite(x))) and bool(jnp.all(jnp.isfinite(offset)))
    print("KERNEL_OK")
</pallas_src>

<mosaic_0001>
module attributes {stable_mosaic.version = 11 : i64} {
  func.func @_conv_band_kernel(%arg0: i32, %arg1: memref<1x18x72xbf16, #tpu.memory_space<vmem>>, %arg2: memref<3x72x288xbf16, #tpu.memory_space<vmem>>, %arg3: memref<1x288xf32, #tpu.memory_space<vmem>>, %arg4: memref<1x16x288xf32, #tpu.memory_space<vmem>>) attributes {dimension_semantics = [#tpu.dimension_semantics<parallel>], iteration_bounds = array<i64: 8>, scalar_prefetch = 0 : i64, scratch_operands = 0 : i64, tpu.core_type = #tpu.core_type<tc>, window_params = [{transform_indices = @transform_0, window_bounds = array<i64: 1, 18, 72>}, {pipeline_mode = #tpu.pipeline_mode<synchronous>, transform_indices = @transform_1, window_bounds = array<i64: 3, 72, 288>}, {pipeline_mode = #tpu.pipeline_mode<synchronous>, transform_indices = @transform_2, window_bounds = array<i64: 1, 288>}, {transform_indices = @transform_3, window_bounds = array<i64: 1, 16, 288>}]} {
    %c0 = arith.constant 0 : index
    %c0_0 = arith.constant 0 : index
    %c0_1 = arith.constant 0 : index
    %0 = vector.load %arg1[%c0, %c0_0, %c0_1] : memref<1x18x72xbf16, #tpu.memory_space<vmem>>, vector<1x18x72xbf16>
    %1 = vector.shape_cast %0 : vector<1x18x72xbf16> to vector<18x72xbf16>
    %cst = arith.constant 0.000000e+00 : f32
    %2 = vector.broadcast %cst : f32 to vector<16x288xf32>
    %c0_2 = arith.constant 0 : index
    %c0_3 = arith.constant 0 : index
    %3 = vector.load %arg3[%c0_2, %c0_3] : memref<1x288xf32, #tpu.memory_space<vmem>>, vector<1x288xf32>
    %4 = vector.broadcast %3 : vector<1x288xf32> to vector<16x288xf32>
    %5 = arith.addf %2, %4 : vector<16x288xf32>
    %6 = vector.extract_strided_slice %1 {offsets = [0, 0], sizes = [16, 72], strides = [1, 1]} : vector<18x72xbf16> to vector<16x72xbf16>
    %c0_4 = arith.constant 0 : index
    %c0_5 = arith.constant 0 : index
    %c0_6 = arith.constant 0 : index
    %7 = vector.load %arg2[%c0_4, %c0_5, %c0_6] : memref<3x72x288xbf16, #tpu.memory_space<vmem>>, vector<1x72x288xbf16>
    %8 = vector.shape_cast %7 : vector<1x72x288xbf16> to vector<72x288xbf16>
    %cst_7 = arith.constant dense<0.000000e+00> : vector<16x288xf32>
    %9 = tpu.matmul %6, %8, %cst_7 {dimension_numbers = #tpu.dot_dimension_numbers<[1], [0], [0], [1], [0, 0, 1, 1], [], []>} : vector<16x72xbf16>, vector<72x288xbf16>, vector<16x288xf32> -> vector<16x288xf32>
    %10 = arith.addf %5, %9 : vector<16x288xf32>
    %11 = vector.extract_strided_slice %1 {offsets = [1, 0], sizes = [16, 72], strides = [1, 1]} : vector<18x72xbf16> to vector<16x72xbf16>
    %c1 = arith.constant 1 : index
    %c0_8 = arith.constant 0 : index
    %c0_9 = arith.constant 0 : index
    %12 = vector.load %arg2[%c1, %c0_8, %c0_9] : memref<3x72x288xbf16, #tpu.memory_space<vmem>>, vector<1x72x288xbf16>
    %13 = vector.shape_cast %12 : vector<1x72x288xbf16> to vector<72x288xbf16>
    %cst_10 = arith.constant dense<0.000000e+00> : vector<16x288xf32>
    %14 = tpu.matmul %11, %13, %cst_10 {dimension_numbers = #tpu.dot_dimension_numbers<[1], [0], [0], [1], [0, 0, 1, 1], [], []>} : vector<16x72xbf16>, vector<72x288xbf16>, vector<16x288xf32> -> vector<16x288xf32>
    %15 = arith.addf %10, %14 : vector<16x288xf32>
    %16 = vector.extract_strided_slice %1 {offsets = [2, 0], sizes = [16, 72], strides = [1, 1]} : vector<18x72xbf16> to vector<16x72xbf16>
    %c2 = arith.constant 2 : index
    %c0_11 = arith.constant 0 : index
    %c0_12 = arith.constant 0 : index
    %17 = vector.load %arg2[%c2, %c0_11, %c0_12] : memref<3x72x288xbf16, #tpu.memory_space<vmem>>, vector<1x72x288xbf16>
    %18 = vector.shape_cast %17 : vector<1x72x288xbf16> to vector<72x288xbf16>
    %cst_13 = arith.constant dense<0.000000e+00> : vector<16x288xf32>
    %19 = tpu.matmul %16, %18, %cst_13 {dimension_numbers = #tpu.dot_dimension_numbers<[1], [0], [0], [1], [0, 0, 1, 1], [], []>} : vector<16x72xbf16>, vector<72x288xbf16>, vector<16x288xf32> -> vector<16x288xf32>
    %20 = arith.addf %15, %19 : vector<16x288xf32>
    %21 = arith.negf %20 : vector<16x288xf32>
    %22 = math.exp %21 : vector<16x288xf32>
    %cst_14 = arith.constant 1.000000e+00 : f32
    %23 = vector.broadcast %cst_14 : f32 to vector<16x288xf32>
    %24 = arith.addf %23, %22 : vector<16x288xf32>
    %25 = arith.divf %23, %24 : vector<16x288xf32>
    %cst_15 = arith.constant 1.000000e+02 : f32
    %26 = vector.broadcast %cst_15 : f32 to vector<16x288xf32>
    %27 = arith.mulf %26, %25 : vector<16x288xf32>
    %cst_16 = arith.constant 5.000000e+01 : f32
    %28 = vector.broadcast %cst_16 : f32 to vector<16x288xf32>
    %29 = arith.subf %27, %28 : vector<16x288xf32>
    %c0_17 = arith.constant 0 : index
    %c0_18 = arith.constant 0 : index
    %c0_19 = arith.constant 0 : index
    %30 = vector.load %arg4[%c0_17, %c0_18, %c0_19] : memref<1x16x288xf32, #tpu.memory_space<vmem>>, vector<1x16x288xf32>
    %31 = vector.shape_cast %30 : vector<1x16x288xf32> to vector<16x288xf32>
    %32 = vector.shape_cast %29 : vector<16x288xf32> to vector<1x16x288xf32>
    tpu.vector_store %arg4[%c0_17, %c0_18, %c0_19], %32 {strides = array<i32>} : memref<1x16x288xf32, #tpu.memory_space<vmem>>, vector<1x16x288xf32>,
    return
  }
  func.func @transform_0(%arg0: i32) -> (i32, i32, i32) {
    %c0_i32 = arith.constant 0 : i32
    %c0_i32_0 = arith.constant 0 : i32
    %c0_i32_1 = arith.constant 0 : i32
    return %arg0, %c0_i32, %c0_i32_0 : i32, i32, i32
  }
  func.func @transform_1(%arg0: i32) -> (i32, i32, i32) {
    %c0_i32 = arith.constant 0 : i32
    %c0_i32_0 = arith.constant 0 : i32
    %c0_i32_1 = arith.constant 0 : i32
    %c0_i32_2 = arith.constant 0 : i32
    return %c0_i32, %c0_i32_0, %c0_i32_1 : i32, i32, i32
  }
  func.func @transform_2(%arg0: i32) -> (i32, i32) {
    %c0_i32 = arith.constant 0 : i32
    %c0_i32_0 = arith.constant 0 : i32
    %c0_i32_1 = arith.constant 0 : i32
    return %c0_i32, %c0_i32_0 : i32, i32
  }
  func.func @transform_3(%arg0: i32) -> (i32, i32, i32) {
    %c0_i32 = arith.constant 0 : i32
    %c0_i32_0 = arith.constant 0 : i32
    %c0_i32_1 = arith.constant 0 : i32
    return %arg0, %c0_i32, %c0_i32_0 : i32, i32, i32
  }
}

</mosaic_0001>

<bundles_post_ra>
// kernel: tile.8
= control target key start
LH: loop header
LB: loop body
LE: loop exit
PB: predicated region body
PF: predicated region fallthrough
CT: control target
= control target key end

     0   :  { %s28_s0 = inlined_call_operand.vmem [shape: f32[18], index: 0, kind: input, shape index: {}]   ;;  %s29_s1 = inlined_call_operand.vmem [shape: f32[16,18], index: 1, kind: output, shape index: {}]  }
   0x1   :  { %v4_v0 = vld [vmem:[%s28_s0] ss:$0 sm:$0xff] }
   0x2   :  { %5 = vst [vmem:[%s29_s1] sm:$0xff] %v4_v0  ;;  %8 = vst [vmem:[%s29_s1 + $0x8] sm:$0xff] %v4_v0 }

// kernel: tile.9
= control target key start
LH: loop header
LB: loop body
LE: loop exit
PB: predicated region body
PF: predicated region fallthrough
CT: control target
= control target key end

     0   :  { %vm9_vm0 = vcmask 15360   ;;  %vm22_vm1 = vcmask 31744   ;;  %s173_s14 = smov 126   ;;  %s174_s15 = smov 108   ;;  %vm3_vm2 = vcmask 146432   ;;  %vm13_vm3 = vcmask 130048   ;;  %s261_s0 = inlined_call_operand.vmem [shape: f32[16,18], index: 0, kind: input, shape index: {}]   ;;  %s262_s1 = inlined_call_operand.vmem [shape: f32[1,288], index: 1, kind: output, shape index: {}]  }
   0x1   :  { %v139_v0 = vld [vmem:[%s261_s0 + $0x7] sm:$0x1]   ;;  %v143_v3 = vld [vmem:[%s261_s0 + $0x6] sm:$0x1]   ;;  %v141_v4 = vld [vmem:[%s261_s0 + $0xe] sm:$0x1]  }
   0x2   :  { %v140_v1 = vld [vmem:[%s261_s0 + $0x7] sm:$0x1]   ;;  %34 = vrot.lane.b32.xlu1 %v143_v3, %s174_s15  ;;  %v142_v5 = vld [vmem:[%s261_s0 + $0xe] sm:$0x1]   ;;  %v144_v7 = vld [vmem:[%s261_s0 + $0xd] sm:$0x1]  }
   0x3   :  { %v10_v2 = vsel %vm9_vm0, %v140_v1, %v139_v0  ;;  %v23_v6 = vsel %vm22_vm1, %v142_v5, %v141_v4  ;;  %s175_s20 = smov 124   ;;  %s176_s21 = smov 106   ;;  %v145_v8 = vld [vmem:[%s261_s0 + $0x5] sm:$0x1]   ;;  %v146_v9 = vld [vmem:[%s261_s0 + $0xc] sm:$0x1]  }
   0x4   :  { %11 = vrot.lane.b32.xlu0 %v10_v2, %s173_s14  ;;  %v2_v10 = vld [vmem:[%s261_s0] sm:$0x1]   ;;  %s177_s28 = smov 90   ;;  %s178_s29 = smov 88   ;;  %v147_v11 = vld [vmem:[%s261_s0 + $0x4] sm:$0x1]  }
   0x5   :  { %4 = vst.msk [vmem:[#allocation0] sm:$0x1] %vm3_vm2, %v2_v10   ;;  %v148_v12 = vld [vmem:[%s261_s0 + $0xb] sm:$0x1]   ;;  %s179_s5 = smov 72   ;;  %s180_s6 = smov 70  }
   0x6   :  { %40 = vrot.lane.b32.xlu1 %v144_v7, %s176_s21  ;;  %v149_v13 = vld [vmem:[%s261_s0 + $0x3] sm:$0x1]   ;;  %v150_v14 = vld [vmem:[%s261_s0 + $0xa] sm:$0x1]   ;;  %s181_s11 = smov 54   ;;  %s182_s12 = smov 52  }
   0x7   :  { %v151_v15 = vld [vmem:[%s261_s0 + $0x2] sm:$0x1]   ;;  %v152_v16 = vld [vmem:[%s261_s0 + $0x9] sm:$0x1]   ;;  %s183_s17 = smov 36   ;;  %s184_s18 = smov 34  }
   0x8   :  { %24 = vrot.lane.b32.xlu0 %v23_v6, %s175_s20  ;;  %v153_v17 = vld [vmem:[%s261_s0 + $0x1] sm:$0x1]   ;;  %v154_v18 = vld [vmem:[%s261_s0 + $0x8] sm:$0x1]   ;;  %s185_s23 = smov 18   ;;  %s186_s24 = smov 16  }
   0x9   :  { %v155_v19 = vld [vmem:[%s261_s0 + $0xf] sm:$0x1]   ;;  %s187_s0 = smov 14   ;;  %vm16_vm4 = vcmask 1048560   ;;  %vm36_vm5 = vcmask 1032032   ;;  %vm26_vm6 = vcmask 113664  }
   0xa   :  { %53 = vrot.lane.b32.xlu1 %v146_v9, %s178_s29  ;;  %vm29_vm7 = vcmask 1048544   ;;  %vm42_vm8 = vcmask 1015632   ;;  %vm49_vm9 = vcmask 884432   ;;  %vm55_vm10 = vcmask 868032  }
   0xb   :  { %vm62_vm11 = vcmask 736832   ;;  %vm68_vm12 = vcmask 720432   ;;  %vm75_vm13 = vcmask 589232   ;;  %vm81_vm14 = vcmask 572832  }
   0xc   :  { %47 = vrot.lane.b32.xlu0 %v145_v8, %s177_s28  ;;  %vm88_vm15 = vcmask 441632   ;;  %vm94_vm0 = vcmask 425232   ;;  %vm101_vm1 = vcmask 294032   ;;  %vm107_vm2 = vcmask 277632  }
   0xe   :  { %66 = vrot.lane.b32.xlu1 %v148_v12, %s180_s6 }
  0x10   :  { %60 = vrot.lane.b32.xlu0 %v147_v11, %s179_s5 }
  0x12   :  { %79 = vrot.lane.b32.xlu1 %v150_v14, %s182_s12 }
  0x14   :  { %73 = vrot.lane.b32.xlu0 %v149_v13, %s181_s11 }
  0x16   :  { %92 = vrot.lane.b32.xlu1 %v152_v16, %s184_s18 }
  0x18   :  { %86 = vrot.lane.b32.xlu0 %v151_v15, %s183_s17 }
  0x1a   :  { %105 = vrot.lane.b32.xlu1 %v154_v18, %s186_s24 }
  0x1c   :  { %99 = vrot.lane.b32.xlu0 %v153_v17, %s185_s23 }
  0x20   :  { %112 = vrot.lane.b32.xlu0 %v155_v19, %s187_s0 }
  0x74   :  { %v35_v21 = vpop.permute.xlu1 %34  }
  0x76   :  { %v12_v20 = vpop.permute.xlu0 %11  }
  0x77   :  { %15 = vst.msk [vmem:[#allocation0 + $0x8] sm:$0x1] %vm13_vm3, %v12_v20   ;;  %vm114_vm3 = vcmask 261232  }
  0x78   :  { %17 = vst.msk [vmem:[#allocation0] sm:$0x1] %vm16_vm4, %v12_v20   ;;  %v41_v23 = vpop.permute.xlu1 %40  }
  0x79   :  { %37 = vst.msk [vmem:[#allocation0] sm:$0x1] %vm36_vm5, %v35_v21  }
  0x7a   :  { %v25_v22 = vpop.permute.xlu0 %24  }
  0x7b   :  { %28 = vst.msk [vmem:[#allocation0 + $0x10] sm:$0x1] %vm26_vm6, %v25_v22  }
  0x7c   :  { %31 = vst.msk [vmem:[#allocation0 + $0x8] sm:$0x1] %vm29_vm7, %v25_v22   ;;  %v54_v25 = vpop.permute.xlu1 %53  }
  0x7d   :  { %44 = vst.msk [vmem:[#allocation0 + $0x8] sm:$0x1] %vm42_vm8, %v41_v23  }
  0x7e   :  { %v48_v24 = vpop.permute.xlu0 %47   ;;  %57 = vst.msk [vmem:[#allocation0 + $0x8] sm:$0x1] %vm55_vm10, %v54_v25  }
  0x7f   :  { %50 = vst.msk [vmem:[#allocation0] sm:$0x1] %vm49_vm9, %v48_v24  }
  0x80   :  { %v67_v27 = vpop.permute.xlu1 %66  }
  0x81   :  { %70 = vst.msk [vmem:[#allocation0 + $0x8] sm:$0x1] %vm68_vm12, %v67_v27  }
  0x82   :  { %v61_v26 = vpop.permute.xlu0 %60  }
  0x83   :  { %63 = vst.msk [vmem:[#allocation0] sm:$0x1] %vm62_vm11, %v61_v26  }
  0x84   :  { %v80_v29 = vpop.permute.xlu1 %79  }
  0x85   :  { %83 = vst.msk [vmem:[#allocation0 + $0x8] sm:$0x1] %vm81_vm14, %v80_v29  }
  0x86   :  { %v74_v28 = vpop.permute.xlu0 %73  }
  0x87   :  { %76 = vst.msk [vmem:[#allocation0] sm:$0x1] %vm75_vm13, %v74_v28  }
  0x88   :  { %v93_v31 = vpop.permute.xlu1 %92  }
  0x89   :  { %96 = vst.msk [vmem:[#allocation0 + $0x8] sm:$0x1] %vm94_vm0, %v93_v31  }
  0x8a   :  { %v87_v30 = vpop.permute.xlu0 %86  }
  0x8b   :  { %89 = vst.msk [vmem:[#allocation0] sm:$0x1] %vm88_vm15, %v87_v30  }
  0x8c   :  { %v106_v33 = vpop.permute.xlu1 %105  }
  0x8d   :  { %109 = vst.msk [vmem:[#allocation0 + $0x8] sm:$0x1] %vm107_vm2, %v106_v33  }
  0x8e   :  { %v100_v32 = vpop.permute.xlu0 %99  }
  0x8f   :  { %102 = vst.msk [vmem:[#allocation0] sm:$0x1] %vm101_vm1, %v100_v32  }
  0x92   :  { %v113_v34 = vpop.permute.xlu0 %112  }
  0x93   :  { %116 = vst.msk [vmem:[#allocation0 + $0x10] sm:$0x1] %vm114_vm3, %v113_v34  }
  0x94   :  { %v126_v36 = vld [vmem:[#allocation0 + $0x8] sm:$0x1] }
  0x95   :  { %156 = vst [vmem:[%s262_s1 + $0x1] sm:$0x1] %v126_v36 }
  0x96   :  { %v121_v35 = vld [vmem:[#allocation0] sm:$0x1] }
  0x97   :  { %124 = vst [vmem:[%s262_s1] sm:$0x1] %v121_v35 }
  0x9a   :  { %v132_v37 = vld [vmem:[#allocation0 + $0x10] sm:$0x1] }
  0x9b   :  { %157 = vst [vmem:[%s262_s1 + $0x2] sm:$0x1] %v132_v37 }

// kernel: conv2d_pallas.1
= control target key start
LH: loop header
LB: loop body
LE: loop exit
PB: predicated region body
PF: predicated region fallthrough
CT: control target
= control target key end

     0   :  { %s1209_s12 = smov 0   ;;  %s1419_s0 = inlined_call_operand.vmem [shape: bf16[8,18,72], index: 0, kind: input, shape index: {}]   ;;  %s1420_s1 = inlined_call_operand.vmem [shape: bf16[3,72,288], index: 1, kind: input, shape index: {}]   ;;  %s1421_s2 = inlined_call_operand.vmem [shape: f32[1,288], index: 2, kind: input, shape index: {}]   ;;  %s1422_s3 = inlined_call_operand.vmem [shape: f32[8,16,288], index: 3, kind: output, shape index: {}]  }
   0x1 LB: > { %s909_s13 = sadd.s32 4294967295, %s1184_s12   ;;  %p913_p0 = scmp.ge.s32.totalorder %s1184_s12, 1  ;;  %s1184_s12 = sphi %s1209_s12, %s13_s12  }
   0x2   : > { %p137_p1 = scmp.lt.s32.totalorder %s1184_s12, 9 }
   0x4   : > { %p138_p2 = pnand %p913_p0, %p137_p1 }
   0x5   : > { %p161_p3 = scmp.lt.s32.totalorder (!%p138_p2), %s909_s13, 7 }
   0x6   : > { %141 = sbr.rel (%p138_p2) target bundleno = 312 (0x138), region = 32 }
   0xb   : > { %v211_v0 = vld [vmem:[%s1420_s1 + $0x60] sm:$0xff]  ;;  %vm294_vm0 = vcmask 1043456   ;;  %v1186_v2 = vmov 0.0   ;;  %v1097_v4 = vld [vmem:[%s1420_s1 + $0x68] ss:$0 sps:$4 sm:$0xff]   ;;  %v1187_v6 = vmov 0  }
   0xc   : > { %v930_v1 = vcombine.high %v211_v0, %v211_v0  ;;  %1040 = vmatprep.subr.bf16.mxu1 %v1186_v2  ;;  %v929_v3 = vcombine.low %v211_v0, %v211_v0  ;;  %v1098_v5 = vld [vmem:[%s1420_s1 + $0x4c] ss:$12 sps:$4 sm:$0xff]   ;;  %336 = vmatprep.mubr.bf16.mxu0 %v1187_v6  ;;  %v302_v8 = vsel %vm294_vm0, %v1097_v4, 0  ;;  %v1100_v9 = vld [vmem:[%s1420_s1 + $0x48] ss:$12 sps:$4 sm:$0xff]   ;;  %vm1188_vm1 = vmmov 0  }
   0xd   : > { %1041 = vmatpush3.bf16.msra.mxu1 %v302_v8  ;;  %v1101_v10 = vld [vmem:[%s1420_s1 + $0x50] ss:$12 sps:$4 sm:$0xff]   ;;  %v1102_v11 = vld [vmem:[%s1420_s1 + $0x34] ss:$12 sps:$4 sm:$0xff]   ;;  %1050 = vmatprep.mubr.msk.bf16.mxu1 %vm1188_vm1, %v1186_v2  ;;  %v1105_v13 = vld [vmem:[%s1420_s1 + $0x38] ss:$12 sps:$4 sm:$0xff]  }
   0xe   : > { %932 = vmatprep.subr.msk.bf16.mxu0 %vm294_vm0, %v930_v1  ;;  %v296_v7 = vsel %vm294_vm0, %v929_v3, 0  ;;  %1042 = vmatprep.subr.bf16.mxu1 %v1186_v2  ;;  %v1104_v12 = vld [vmem:[%s1420_s1 + $0x30] ss:$12 sps:$4 sm:$0xff]   ;;  %s1424_s13 = smov (!%p161_p3, %s909_s13), 7  ;;  %v1108_v15 = vld [vmem:[%s1420_s1 + $0x18] ss:$12 sps:$4 sm:$0xff]  }
   0xf   : > { %311 = vmatpush1.bf16.msra.mxu0 %v296_v7  ;;  %v1106_v14 = vld [vmem:[%s1420_s1 + $0x1c] ss:$12 sps:$4 sm:$0xff]   ;;  %s1082_s5 = smul.u32 12, %s1424_s13  ;;  %v1109_v16 = vld [vmem:[%s1420_s1 + $0x20] ss:$12 sps:$4 sm:$0xff]   ;;  %vm290_vm2 = vcmask 588800  }
  0x10   : > { %312 = vmatprep.subr.bf16.mxu0 %v1098_v5  ;;  %v1110_v17 = vld [vmem:[%s1420_s1 + $0x4] ss:$12 sps:$4 sm:$0xff]   ;;  %v1112_v19 = vld [vmem:[%s1420_s1] ss:$12 sps:$4 sm:$0xff]   ;;  %v1113_v20 = vld [vmem:[%s1420_s1 + $0x8] ss:$12 sps:$4 sm:$0xff]  }
  0x11   : > { %1043 = vmatpush3.bf16.msra.mxu1 %v1101_v10  ;;  %s1269_s14 = scalar_lea.vmem %s1419_s0, %s1082_s5  ;;  %v951_v18 = vld [vmem:[%s1420_s1 + $0xcc] sm:$0xff]  ;;  %v1117_v23 = vld [vmem:[%s1420_s1 + $0xd4] ss:$0 sps:$4 sm:$0xff]   ;;  %v1120_v25 = vld [vmem:[%s1420_s1 + $0xb8] ss:$12 sps:$4 sm:$0xff]   ;;  %vm621_vm4 = vcmask 1046528  }
  0x12   : > { %1044 = vmatprep.subr.bf16.mxu1 %v1186_v2  ;;  %v967_v21 = vcombine.high %v951_v18, %v951_v18  ;;  %v966_v22 = vcombine.low %v951_v18, %v951_v18  ;;  %v1289_v24 = vld [vmem:[%s1269_s14] sm:$0xff]   ;;  %v510_v27 = vsel %vm294_vm0, %v1117_v23, 0  ;;  %v1121_v29 = vld [vmem:[%s1420_s1 + $0xbc] ss:$12 sps:$4 sm:$0xff]   ;;  %v1129_v37 = vld [vmem:[%s1420_s1 + $0x8c] ss:$12 sps:$4 sm:$0xff]  }
  0x13   : > { %313 = vmatpush1.bf16.msra.mxu0 %v1100_v9  ;;  %v1118_v28 = vld [vmem:[%s1420_s1 + $0xb4] ss:$12 sps:$4 sm:$0xff]   ;;  %v1122_v31 = vld [vmem:[%s1420_s1 + $0x9c] ss:$12 sps:$4 sm:$0xff]   ;;  %v1125_v32 = vld [vmem:[%s1420_s1 + $0xa4] ss:$12 sps:$4 sm:$0xff]  }
  0x14   : > { %314 = vmatprep.subr.bf16.mxu0 %v1102_v11  ;;  %v504_v26 = vsel %vm294_vm0, %v966_v22, 0  ;;  %v1124_v30 = vld [vmem:[%s1420_s1 + $0xa0] ss:$12 sps:$4 sm:$0xff]   ;;  %v1322_v33 = vld [vmem:[%s1269_s14 + $0x8] ss:$0 sps:$4 sm:$0x11]  }
  0x15   : > { %1045 = vmatpush3.bf16.msra.mxu1 %v1105_v13  ;;  %v419_v34 = vshll.u32 %v1289_v24, 16  ;;  %v1128_v35 = vld [vmem:[%s1420_s1 + $0x88] ss:$12 sps:$4 sm:$0xff]   ;;  %v1126_v36 = vld [vmem:[%s1420_s1 + $0x84] ss:$12 sps:$4 sm:$0xff]   ;;  %v417_v38 = vshrl.u32 %v1289_v24, 16  ;;  %v177_v13 = vlaneseq }
  0x16   : > { %1046 = vmatprep.subr.bf16.mxu1 %v1186_v2  ;;  %v424_v40 = vshll.u32 %v1322_v33, 16  ;;  %v1132_v41 = vld [vmem:[%s1420_s1 + $0x70] ss:$12 sps:$4 sm:$0xff]   ;;  %v1130_v43 = vld [vmem:[%s1420_s1 + $0x6c] ss:$12 sps:$4 sm:$0xff]   ;;  %v622_v1 = vrot.slane %v1289_v24, 1 }
  0x17   : > { %315 = vmatpush1.bf16.msra.mxu0 %v1104_v12  ;;  %v421_v39 = vrot.slane %v419_v34, 1  ;;  %v988_v42 = vld [vmem:[%s1420_s1 + $0x138] sm:$0xff]  ;;  %v1133_v44 = vld [vmem:[%s1420_s1 + $0x74] ss:$12 sps:$4 sm:$0xff]   ;;  %vm416_vm3 = vsmask.f32 7424 }
  0x18   : > { %316 = vmatprep.subr.bf16.mxu0 %v1106_v14  ;;  %v426_v46 = vrot.slane %v424_v40, 1  ;;  %v1003_v47 = vcombine.high %v988_v42, %v988_v42  ;;  %v1002_v48 = vcombine.low %v988_v42, %v988_v42  ;;  %v1137_v49 = vld [vmem:[%s1420_s1 + $0x140] ss:$0 sps:$4 sm:$0xff]   ;;  %v1140_v53 = vld [vmem:[%s1420_s1 + $0x124] ss:$12 sps:$4 sm:$0xff]   ;;  %v623_v3 = vrot.slane %v1322_v33, 1 }
  0x19   : > { %1047 = vmatpush3.bf16.msra.mxu1 %v1109_v16  ;;  %v422_v45 = vor.u32 %v421_v39, %v417_v38  ;;  %v707_v52 = vsel %vm294_vm0, %v1137_v49, 0  ;;  %v1138_v54 = vld [vmem:[%s1420_s1 + $0x120] ss:$12 sps:$4 sm:$0xff]   ;;  %v1141_v55 = vld [vmem:[%s1420_s1 + $0x128] ss:$12 sps:$4 sm:$0xff]   ;;  %v178_v16 = vshrl.u32 %v177_v13, 7 }
  0x1a   : > { %1048 = vmatprep.subr.bf16.mxu1 %v1186_v2  ;;  %v701_v51 = vsel %vm294_vm0, %v1002_v48, 0  ;;  %v1144_v56 = vld [vmem:[%s1420_s1 + $0x10c] ss:$12 sps:$4 sm:$0xff]   ;;  %v1142_v57 = vld [vmem:[%s1420_s1 + $0x108] ss:$12 sps:$4 sm:$0xff]   ;;  %v624_v4 = vsel %vm621_vm4, %v622_v1, %v623_v3  ;;  %s1083_s29 = smul.u32 48, %s1424_s13 }
  0x1b   : > { %317 = vmatpush1.bf16.msra.mxu0 %v1108_v15  ;;  %v427_v50 = vsel %vm416_vm3, %v422_v45, %v426_v46  ;;  %v1145_v58 = vld [vmem:[%s1420_s1 + $0x110] ss:$12 sps:$4 sm:$0xff]   ;;  %v1148_v59 = vld [vmem:[%s1420_s1 + $0xf4] ss:$12 sps:$4 sm:$0xff]   ;;  %v1149_v61 = vld [vmem:[%s1420_s1 + $0xf8] ss:$12 sps:$4 sm:$0xff]  }
  0x1c   : > { %318 = vmatprep.subr.bf16.mxu0 %v1110_v17  ;;  %v1146_v60 = vld [vmem:[%s1420_s1 + $0xf0] ss:$12 sps:$4 sm:$0xff]   ;;  %v1150_v63 = vld [vmem:[%s1420_s1 + $0xd8] ss:$12 sps:$4 sm:$0xff]   ;;  %v1153_v0 = vld [vmem:[%s1420_s1 + $0xe0] ss:$12 sps:$4 sm:$0xff]   ;;  %s170_s5 = scalar_lea.vmem %s1422_s3, %s1083_s29 }
  0x1d   : > { %1049 = vmatpush3.bf16.msra.mxu1 %v1113_v20  ;;  %v1152_v62 = vld [vmem:[%s1420_s1 + $0xdc] ss:$12 sps:$4 sm:$0xff]   ;;  %v187_v20 = vsub.s32 2, %v178_v16  ;;  %v183_v23 = vsub.s32 1, %v178_v16  ;;  %vm849_vm5 = vcmask 261120  }
  0x1e   : > { %1054 = vmatprep.subr.bf16.mxu1 %v1186_v2 }
  0x1f   : > { %319 = vmatpush1.bf16.msra.mxu0 %v1112_v19  ;;  %v179_v19 = vsub.s32 0, %v178_v16 }
  0x20   : > { %969 = vmatprep.subr.msk.bf16.mxu0 %vm294_vm0, %v967_v21  ;;  %1051 = vmatmul.mubr.msk.bf16.vlgmr.msra.gmra.mxu1 %vm290_vm2, %v1289_v24  ;;  %v175_v21 = vld [vmem:[%s1421_s2] sm:$0x7] }
  0x21   : > { %1055 = vmatpush3.bf16.msra.mxu1 %v510_v27  ;;  %1064 = vmatprep.mubr.msk.bf16.mxu1 %vm1188_vm1, %v1186_v2  ;;  %v184_v27 = vrot.slane %v175_v21, %v183_v23 }
  0x22   : > { %933 = vmatmul.mubr.msk.bf16.vlgmr.msra.gmra.mxu0 %vm290_vm2, %v1289_v24  ;;  %1056 = vmatprep.subr.bf16.mxu1 %v1186_v2  ;;  %v180_v24 = vrot.slane %v175_v21, %v179_v19 }
  0x23   : > { %519 = vmatpush1.bf16.msra.mxu0 %v504_v26  ;;  %544 = vmatprep.mubr.bf16.mxu0 %v1187_v6 }
  0x24   : > { %520 = vmatprep.subr.bf16.mxu0 %v1120_v25  ;;  %v188_v25 = vrot.slane %v175_v21, %v187_v20 }
  0x25   : > { %1057 = vmatpush3.bf16.msra.mxu1 %v1121_v29 }
  0x26   : > { %1058 = vmatprep.subr.bf16.mxu1 %v1186_v2 }
  0x27   : > { %521 = vmatpush1.bf16.msra.mxu0 %v1118_v28 }
  0x28   : > { %522 = vmatprep.subr.bf16.mxu0 %v1124_v30 }
  0x29   : > { %1059 = vmatpush3.bf16.msra.mxu1 %v1125_v32 }
  0x2a   : > { %1060 = vmatprep.subr.bf16.mxu1 %v1186_v2 }
  0x2b   : > { %523 = vmatpush1.bf16.msra.mxu0 %v1122_v31 }
  0x2c   : > { %524 = vmatprep.subr.bf16.mxu0 %v1128_v35 }
  0x2d   : > { %1061 = vmatpush3.bf16.msra.mxu1 %v1129_v37 }
  0x2e   : > { %1062 = vmatprep.subr.bf16.mxu1 %v1186_v2 }
  0x2f   : > { %525 = vmatpush1.bf16.msra.mxu0 %v1126_v36 }
  0x30   : > { %526 = vmatprep.subr.bf16.mxu0 %v1132_v41 }
  0x31   : > { %1063 = vmatpush3.bf16.msra.mxu1 %v1133_v44 }
  0x32   : > { %1068 = vmatprep.subr.bf16.mxu1 %v1186_v2 }
  0x33   : > { %527 = vmatpush1.bf16.msra.mxu0 %v1130_v43 }
  0x34   : > { %1005 = vmatprep.subr.msk.bf16.mxu0 %vm294_vm0, %v1003_v47  ;;  %1065 = vmatmul.mubr.msk.bf16.vlgmr.msra.gmra.mxu1 %vm290_vm2, %v427_v50 }
  0x35   : > { %1069 = vmatpush3.bf16.msra.mxu1 %v707_v52  ;;  %1078 = vmatprep.mubr.msk.bf16.mxu1 %vm1188_vm1, %v1186_v2 }
  0x36   : > { %970 = vmatmul.mubr.msk.bf16.vlgmr.msra.gmra.mxu0 %vm290_vm2, %v427_v50  ;;  %1070 = vmatprep.subr.bf16.mxu1 %v1186_v2 }
  0x37   : > { %716 = vmatpush1.bf16.msra.mxu0 %v701_v51  ;;  %741 = vmatprep.mubr.bf16.mxu0 %v1187_v6 }
  0x38   : > { %717 = vmatprep.subr.bf16.mxu0 %v1140_v53 }
  0x39   : > { %1071 = vmatpush3.bf16.msra.mxu1 %v1141_v55 }
  0x3a   : > { %1072 = vmatprep.subr.bf16.mxu1 %v1186_v2 }
  0x3b   : > { %718 = vmatpush1.bf16.msra.mxu0 %v1138_v54 }
  0x3c   : > { %719 = vmatprep.subr.bf16.mxu0 %v1144_v56 }
  0x3d   : > { %1073 = vmatpush3.bf16.msra.mxu1 %v1145_v58 }
  0x3e   : > { %1074 = vmatprep.subr.bf16.mxu1 %v1186_v2 }
  0x3f   : > { %720 = vmatpush1.bf16.msra.mxu0 %v1142_v57 }
  0x40   : > { %721 = vmatprep.subr.bf16.mxu0 %v1148_v59 }
  0x41   : > { %1075 = vmatpush3.bf16.msra.mxu1 %v1149_v61 }
  0x42   : > { %1076 = vmatprep.subr.bf16.mxu1 %v1186_v2 }
  0x43   : > { %722 = vmatpush1.bf16.msra.mxu0 %v1146_v60 }
  0x44   : > { %723 = vmatprep.subr.bf16.mxu0 %v1152_v62 }
  0x45   : > { %1077 = vmatpush3.bf16.msra.mxu1 %v1153_v0 }
  0x47   : > { %724 = vmatpush1.bf16.msra.mxu0 %v1150_v63 }
  0x48   : > { %1079 = vmatmul.mubr.msk.bf16.vlgmr.msra.gmra.mxu1 %vm290_vm2, %v624_v4 }
  0x4a   : > { %1006 = vmatmul.mubr.msk.bf16.vlgmr.msra.gmra.mxu0 %vm290_vm2, %v624_v4 }
  0xe0   : > { %v381_v5 = vpop.f32.mrf.mxu1 }
  0xe1   : > { %v390_v29 = vadd.f32 %v381_v5, %v188_v25 }
  0xe2   : > { %v1052_v6 = vpop.f32.mrf.mxu1  ;;  %v338_v9 = vpop.f32.mrf.mxu0 }
  0xe3   : > { %v388_v28 = vadd.f32 %v338_v9, %v180_v24 }
  0xe4   : > { %v384_v7 = vpop.f32.mrf.mxu1  ;;  %v340_v10 = vpop.f32.mrf.mxu0 }
  0xe5   : > { %v389_v31 = vadd.f32 %v340_v10, %v184_v27  ;;  %v393_v37 = vadd.f32 %v384_v7, %v188_v25 }
  0xe6   : > { %v1053_v8 = vpop.f32.mrf.mxu1  ;;  %v342_v11 = vpop.f32.mrf.mxu0 }
  0xe7   : > { %v391_v34 = vadd.f32 %v342_v11, %v180_v24 }
  0xe8   : > { %v344_v15 = vpop.f32.mrf.mxu0 }
  0xe9   : > { %v392_v41 = vadd.f32 %v344_v15, %v184_v27 }
  0xf4   : > { %v589_v12 = vpop.f32.mrf.mxu1 }
  0xf5   : > { %v598_v33 = vadd.f32 %v589_v12, %v390_v29 }
  0xf6   : > { %v1066_v14 = vpop.f32.mrf.mxu1  ;;  %v546_v17 = vpop.f32.mrf.mxu0 }
  0xf7   : > { %v596_v32 = vadd.f32 %v546_v17, %v388_v28 }
  0xf8   : > { %v592_v2 = vpop.f32.mrf.mxu1  ;;  %v548_v22 = vpop.f32.mrf.mxu0 }
  0xf9   : > { %v597_v38 = vadd.f32 %v548_v22, %v389_v31  ;;  %v601_v45 = vadd.f32 %v592_v2, %v393_v37 }
  0xfa   : > { %v1067_v18 = vpop.f32.mrf.mxu1  ;;  %v550_v26 = vpop.f32.mrf.mxu0 }
  0xfb   : > { %v599_v42 = vadd.f32 %v550_v26, %v391_v34 }
  0xfc   : > { %v552_v30 = vpop.f32.mrf.mxu0 }
  0xfd   : > { %v600_v49 = vadd.f32 %v552_v30, %v392_v41 }
 0x108   : > { %v786_v36 = vpop.f32.mrf.mxu1 }
 0x109   : > { %v795_v40 = vadd.f32 %v786_v36, %v598_v33 }
 0x10a   : > { %v743_v35 = vpop.f32.mrf.mxu0  ;;  %v1080_v44 = vpop.f32.mrf.mxu1 }
 0x10b   : > { %v793_v39 = vadd.f32 %v743_v35, %v596_v32  ;;  %v1010_v47 = vmul.f32 -1.442695, %v795_v40 }
 0x10c   : > { %v745_v43 = vpop.f32.mrf.mxu0  ;;  %v789_v51 = vpop.f32.mrf.mxu1 }
 0x10d   : > { %v1008_v46 = vmul.f32 -1.442695, %v793_v39  ;;  %v794_v48 = vadd.f32 %v745_v43, %v597_v38  ;;  %v798_v54 = vadd.f32 %v789_v51, %v601_v45 }
 0x10e   : > { %v747_v50 = vpop.f32.mrf.mxu0  ;;  %v1081_v56 = vpop.f32.mrf.mxu1 }
 0x10f   : > { %1154 = vpow2.f32 %v1008_v46  ;;  %v1009_v52 = vmul.f32 -1.442695, %v794_v48  ;;  %v796_v53 = vadd.f32 %v747_v50, %v599_v42  ;;  %v1013_v58 = vmul.f32 -1.442695, %v798_v54 }
 0x110   : > { %1156 = vpow2.f32 %v1010_v47  ;;  %v749_v55 = vpop.f32.mrf.mxu0 }
 0x111   : > { %1158 = vpow2.f32 %v1009_v52  ;;  %v1011_v57 = vmul.f32 -1.442695, %v796_v53  ;;  %v797_v59 = vadd.f32 %v749_v55, %v600_v49 }
 0x113   : > { %1160 = vpow2.f32 %v1011_v57  ;;  %v1012_v60 = vmul.f32 -1.442695, %v797_v59 }
 0x114   : > { %1162 = vpow2.f32 %v1013_v58 }
 0x115   : > { %1164 = vpow2.f32 %v1012_v60 }
 0x11c   : > { %v1155_v61 = vpop.eup %1154 }
 0x11d   : > { %v1157_v62 = vpop.eup %1156  ;;  %v817_v63 = vadd.f32 1.0, %v1155_v61 }
 0x11e   : > { %v1159_v0 = vpop.eup %1158  ;;  %v819_v1 = vadd.f32 1.0, %v1157_v62 }
 0x11f   : > { %1166 = vrcp.f32 %v817_v63  ;;  %v818_v3 = vadd.f32 1.0, %v1159_v0 }
 0x120   : > { %v1161_v4 = vpop.eup %1160  ;;  %1168 = vrcp.f32 %v819_v1 }
 0x121   : > { %v1163_v5 = vpop.eup %1162  ;;  %1170 = vrcp.f32 %v818_v3  ;;  %v820_v6 = vadd.f32 1.0, %v1161_v4 }
 0x122   : > { %v1165_v7 = vpop.eup %1164  ;;  %v822_v8 = vadd.f32 1.0, %v1163_v5 }
 0x123   : > { %1172 = vrcp.f32 %v820_v6  ;;  %v821_v9 = vadd.f32 1.0, %v1165_v7 }
 0x124   : > { %1174 = vrcp.f32 %v822_v8 }
 0x125   : > { %1176 = vrcp.f32 %v821_v9 }
 0x12c   : > { %v1167_v10 = vpop.eup %1166 }
 0x12d   : > { %v1169_v11 = vpop.eup %1168  ;;  %v835_v12 = vmul.f32 100.0, %v1167_v10 }
 0x12e   : > { %v1171_v13 = vpop.eup %1170  ;;  %v837_v14 = vmul.f32 100.0, %v1169_v11 }
 0x12f   : > { %v1014_v15 = vadd.f32 -50.0, %v835_v12  ;;  %v836_v2 = vmul.f32 100.0, %v1171_v13 }
 0x130   : > { %v1173_v16 = vpop.eup %1172  ;;  %v1016_v17 = vadd.f32 -50.0, %v837_v14 }
 0x131   : > { %v1175_v18 = vpop.eup %1174  ;;  %847 = vst [vmem:[%s170_s5] sm:$0xff] %v1014_v15  ;;  %v1015_v19 = vadd.f32 -50.0, %v836_v2  ;;  %v838_v20 = vmul.f32 100.0, %v1173_v16 }
 0x132   : > { %v1177_v21 = vpop.eup %1176  ;;  %850 = vst.msk [vmem:[%s170_s5 + $0x10] sm:$0xff] %vm849_vm5, %v1016_v17  ;;  %v840_v22 = vmul.f32 100.0, %v1175_v18 }
 0x133   : > { %848 = vst [vmem:[%s170_s5 + $0x8] sm:$0xff] %v1015_v19  ;;  %v1017_v23 = vadd.f32 -50.0, %v838_v20  ;;  %v839_v24 = vmul.f32 100.0, %v1177_v21 }
 0x134   : > { %v1019_v25 = vadd.f32 -50.0, %v840_v22 }
 0x135   : > { %851 = vst [vmem:[%s170_s5 + $0x18] sm:$0xff] %v1017_v23  ;;  %v1018_v26 = vadd.f32 -50.0, %v839_v24 }
 0x136   : > { %853 = vst.msk [vmem:[%s170_s5 + $0x28] sm:$0xff] %vm849_vm5, %v1019_v25 }
 0x137   : > { %852 = vst [vmem:[%s170_s5 + $0x20] sm:$0xff] %v1018_v26 }
 0x138 PF: > { %s13_s12 = sadd.s32 1, %s1184_s12  }
 0x139   : > { %p10_p4 = scmp.ge.s32.totalorder %s13_s12, 10  }
 0x13b   :  { %12 = sbr.rel (!%p10_p4) target bundleno = 1 (0x1), region = 64 }

</bundles_post_ra>
